<compile_context>
chip_gen: v7x
topology: tpu7x:2x2x1
jax: 0.10.0
libtpu: 0.0.40
codegen_flags: <defaults>
</compile_context>

<pallas_src>
import jax
import jax.numpy as jnp
from jax.experimental import pallas as pl
from jax.experimental.pallas import tpu as pltpu


def _make_decomp_kernel(kernel_size: int, L: int):
    half = (kernel_size - 1) // 2
    Lp = L + 2 * half  # replicate-padded length (kernel_size odd)

    def decomp_kernel(x_ref, res_ref, mean_ref):
        # x_ref: (TB, L, TC) block of the un-padded input.
        xf = x_ref[...].astype(jnp.float32)
        tb, _, tc = xf.shape  # static

        # Build the replicate-padded series entirely in VMEM (no HBM round trip).
        if half > 0:
            front = jnp.broadcast_to(xf[:, 0:1, :], (tb, half, tc))
            back = jnp.broadcast_to(xf[:, L - 1:L, :], (tb, half, tc))
            xp = jnp.concatenate([front, xf, back], axis=1)  # (TB, Lp, TC)
        else:
            xp = xf

        # Log-depth sliding-window sum of width kernel_size (binary doubling).
        # `cur` holds width-w window sums; valid length shrinks as w grows.
        acc = None
        cur = xp
        cur_len = Lp
        offset = 0
        w = 1
        rem = kernel_size
        while True:
            if rem & 1:
                term = cur[:, offset:offset + L, :]
                acc = term if acc is None else acc + term
                offset += w
            rem >>= 1
            if rem == 0:
                break
            new_len = cur_len - w
            cur = cur[:, :new_len, :] + cur[:, w:w + new_len, :]
            cur_len = new_len
            w <<= 1

        mean_f = acc * (1.0 / kernel_size)
        res_f = xf - mean_f  # f32 residual; cast last for bf16 parity
        mean_ref[...] = mean_f.astype(mean_ref.dtype)
        res_ref[...] = res_f.astype(res_ref.dtype)

    return decomp_kernel


def _choose_tiles(B: int, L: int, C: int, kernel_size: int, itemsize: int):
    """Pick (batch_tile, channel_tile) keeping the per-step VMEM bounded."""
    Lp = L + kernel_size - 1

    # Channel tile: lane-dense (multiple of 128) whenever C allows it.
    tc = C
    if C % 128 == 0:
        for cand in (512, 384, 256, 128):
            if C % cand == 0:
                tc = cand
                break
    # TODO(synk): for C not a multiple of 128 the outputs use masked stores;
    # a (batch,channel)->lane packing would need an HBM transpose, skipped.

    # Batch tile: largest divisor of B that keeps the working set comfortably
    # under the 32 MiB default scoped-VMEM limit (common to v5e/v6e/v7x).
    budget = 12 * 1024 * 1024

    def step_bytes(tb):
        io = 6 * tb * L * tc * itemsize      # input (2 buf) + 2 outputs (2 buf)
        tmp = 5 * tb * Lp * tc * 4           # f32 padded copy + doubling temps
        return io + tmp

    tb = 1
    for cand in range(B, 0, -1):
        if B % cand == 0 and step_bytes(cand) <= budget:
            tb = cand
            break
    return tb, tc


def series_decomp(x: jax.Array, kernel_size: int):
    """x: (B, L, C). Returns (res, moving_mean), both (B, L, C), like the
    PyTorch series_decomp(kernel_size) module (stride=1, odd kernel_size)."""
    assert kernel_size >= 1 and kernel_size % 2 == 1, (
        "series_decomp requires an odd kernel_size (even k is ill-defined in "
        "the reference module)")
    B, L, C = x.shape
    tb, tc = _choose_tiles(B, L, C, kernel_size, jnp.dtype(x.dtype).itemsize)
    grid = (B // tb, C // tc)

    kernel = _make_decomp_kernel(kernel_size, L)
    blk = (tb, L, tc)
    idx = lambda b, c: (b, 0, c)

    out_shape = (
        jax.ShapeDtypeStruct((B, L, C), x.dtype),  # res
        jax.ShapeDtypeStruct((B, L, C), x.dtype),  # moving_mean
    )

    res, mean = pl.pallas_call(
        kernel,
        out_shape=out_shape,
        grid_spec=pltpu.PrefetchScalarGridSpec(
            num_scalar_prefetch=0,
            grid=grid,
            in_specs=[pl.BlockSpec(blk, idx)],
            out_specs=[pl.BlockSpec(blk, idx), pl.BlockSpec(blk, idx)],
        ),
        compiler_params=pltpu.CompilerParams(
            dimension_semantics=("parallel", "parallel"),
        ),
    )(x)
    return res, mean


def _reference(x, kernel_size):
    # Pure-JAX reference mirroring the PyTorch semantics (f32 accumulation).
    half = (kernel_size - 1) // 2
    front = jnp.repeat(x[:, 0:1, :], half, axis=1)
    end = jnp.repeat(x[:, -1:, :], half, axis=1)
    xp = jnp.concatenate([front, x, end], axis=1).astype(jnp.float32)
    L = x.shape[1]
    mean = jnp.mean(
        jnp.stack([xp[:, s:s + L, :] for s in range(kernel_size)], axis=0),
        axis=0,
    )
    res = x.astype(jnp.float32) - mean
    return res.astype(x.dtype), mean.astype(x.dtype)


if __name__ == "__main__":
    key = jax.random.PRNGKey(0)

    configs = [
        # (B, L, C), kernel_size
        ((2, 48, 128), 25),  # lane-dense, channel-tiled path (Autoformer-like k)
        ((2, 16, 7), 5),     # narrow-channel path (full-C block)
    ]

    for i, (shape, ksz) in enumerate(configs):
        x = jax.random.normal(jax.random.fold_in(key, i), shape, dtype=jnp.float32)
        res, mean = series_decomp(x, ksz)
        jax.block_until_ready((res, mean))

        res_ref, mean_ref = _reference(x, ksz)
        assert res.shape == shape and mean.shape == shape
        assert jnp.allclose(mean, mean_ref, atol=1e-5, rtol=1e-5), "moving_mean mismatch"
        assert jnp.allclose(res, res_ref, atol=1e-5, rtol=1e-5), "residual mismatch"

    print("KERNEL_OK")
</pallas_src>

<mosaic_0001>
module attributes {stable_mosaic.version = 11 : i64} {
  func.func @decomp_kernel(%arg0: i32, %arg1: i32, %arg2: memref<2x48x128xf32, #tpu.memory_space<vmem>>, %arg3: memref<2x48x128xf32, #tpu.memory_space<vmem>>, %arg4: memref<2x48x128xf32, #tpu.memory_space<vmem>>) attributes {dimension_semantics = [#tpu.dimension_semantics<parallel>, #tpu.dimension_semantics<parallel>], iteration_bounds = array<i64: 1, 1>, scalar_prefetch = 0 : i64, scratch_operands = 0 : i64, tpu.core_type = #tpu.core_type<tc>, window_params = [{transform_indices = @transform_0, window_bounds = array<i64: 2, 48, 128>}, {transform_indices = @transform_1, window_bounds = array<i64: 2, 48, 128>}, {transform_indices = @transform_2, window_bounds = array<i64: 2, 48, 128>}]} {
    %c0 = arith.constant 0 : index
    %c0_0 = arith.constant 0 : index
    %c0_1 = arith.constant 0 : index
    %0 = vector.load %arg2[%c0, %c0_0, %c0_1] : memref<2x48x128xf32, #tpu.memory_space<vmem>>, vector<2x48x128xf32>
    %1 = vector.extract_strided_slice %0 {offsets = [0, 0, 0], sizes = [2, 1, 128], strides = [1, 1, 1]} : vector<2x48x128xf32> to vector<2x1x128xf32>
    %2 = vector.shape_cast %1 : vector<2x1x128xf32> to vector<2x1x128xf32>
    %3 = vector.broadcast %2 : vector<2x1x128xf32> to vector<2x12x128xf32>
    %4 = vector.extract_strided_slice %0 {offsets = [0, 47, 0], sizes = [2, 1, 128], strides = [1, 1, 1]} : vector<2x48x128xf32> to vector<2x1x128xf32>
    %5 = vector.shape_cast %4 : vector<2x1x128xf32> to vector<2x1x128xf32>
    %6 = vector.broadcast %5 : vector<2x1x128xf32> to vector<2x12x128xf32>
    %7 = tpu.concatenate %3, %0, %6 in 1 : vector<2x12x128xf32>, vector<2x48x128xf32>, vector<2x12x128xf32> -> vector<2x72x128xf32>
    %8 = vector.extract_strided_slice %7 {offsets = [0, 0, 0], sizes = [2, 48, 128], strides = [1, 1, 1]} : vector<2x72x128xf32> to vector<2x48x128xf32>
    %9 = vector.extract_strided_slice %7 {offsets = [0, 0, 0], sizes = [2, 71, 128], strides = [1, 1, 1]} : vector<2x72x128xf32> to vector<2x71x128xf32>
    %10 = vector.extract_strided_slice %7 {offsets = [0, 1, 0], sizes = [2, 71, 128], strides = [1, 1, 1]} : vector<2x72x128xf32> to vector<2x71x128xf32>
    %11 = arith.addf %9, %10 : vector<2x71x128xf32>
    %12 = vector.extract_strided_slice %11 {offsets = [0, 0, 0], sizes = [2, 69, 128], strides = [1, 1, 1]} : vector<2x71x128xf32> to vector<2x69x128xf32>
    %13 = vector.extract_strided_slice %11 {offsets = [0, 2, 0], sizes = [2, 69, 128], strides = [1, 1, 1]} : vector<2x71x128xf32> to vector<2x69x128xf32>
    %14 = arith.addf %12, %13 : vector<2x69x128xf32>
    %15 = vector.extract_strided_slice %14 {offsets = [0, 0, 0], sizes = [2, 65, 128], strides = [1, 1, 1]} : vector<2x69x128xf32> to vector<2x65x128xf32>
    %16 = vector.extract_strided_slice %14 {offsets = [0, 4, 0], sizes = [2, 65, 128], strides = [1, 1, 1]} : vector<2x69x128xf32> to vector<2x65x128xf32>
    %17 = arith.addf %15, %16 : vector<2x65x128xf32>
    %18 = vector.extract_strided_slice %17 {offsets = [0, 1, 0], sizes = [2, 48, 128], strides = [1, 1, 1]} : vector<2x65x128xf32> to vector<2x48x128xf32>
    %19 = arith.addf %8, %18 : vector<2x48x128xf32>
    %20 = vector.extract_strided_slice %17 {offsets = [0, 0, 0], sizes = [2, 57, 128], strides = [1, 1, 1]} : vector<2x65x128xf32> to vector<2x57x128xf32>
    %21 = vector.extract_strided_slice %17 {offsets = [0, 8, 0], sizes = [2, 57, 128], strides = [1, 1, 1]} : vector<2x65x128xf32> to vector<2x57x128xf32>
    %22 = arith.addf %20, %21 : vector<2x57x128xf32>
    %23 = vector.extract_strided_slice %22 {offsets = [0, 9, 0], sizes = [2, 48, 128], strides = [1, 1, 1]} : vector<2x57x128xf32> to vector<2x48x128xf32>
    %24 = arith.addf %19, %23 : vector<2x48x128xf32>
    %cst = arith.constant 4.000000e-02 : f32
    %25 = vector.broadcast %cst : f32 to vector<2x48x128xf32>
    %26 = arith.mulf %24, %25 : vector<2x48x128xf32>
    %27 = arith.subf %0, %26 : vector<2x48x128xf32>
    %c0_2 = arith.constant 0 : index
    %c0_3 = arith.constant 0 : index
    %c0_4 = arith.constant 0 : index
    %28 = vector.load %arg4[%c0_2, %c0_3, %c0_4] : memref<2x48x128xf32, #tpu.memory_space<vmem>>, vector<2x48x128xf32>
    tpu.vector_store %arg4[%c0_2, %c0_3, %c0_4], %26 {strides = array<i32>} : memref<2x48x128xf32, #tpu.memory_space<vmem>>, vector<2x48x128xf32>,
    %c0_5 = arith.constant 0 : index
    %c0_6 = arith.constant 0 : index
    %c0_7 = arith.constant 0 : index
    %29 = vector.load %arg3[%c0_5, %c0_6, %c0_7] : memref<2x48x128xf32, #tpu.memory_space<vmem>>, vector<2x48x128xf32>
    tpu.vector_store %arg3[%c0_5, %c0_6, %c0_7], %27 {strides = array<i32>} : memref<2x48x128xf32, #tpu.memory_space<vmem>>, vector<2x48x128xf32>,
    return
  }
  func.func @transform_0(%arg0: i32, %arg1: i32) -> (i32, i32, i32) {
    %c0_i32 = arith.constant 0 : i32
    %c0_i32_0 = arith.constant 0 : i32
    return %arg0, %c0_i32, %arg1 : i32, i32, i32
  }
  func.func @transform_1(%arg0: i32, %arg1: i32) -> (i32, i32, i32) {
    %c0_i32 = arith.constant 0 : i32
    %c0_i32_0 = arith.constant 0 : i32
    return %arg0, %c0_i32, %arg1 : i32, i32, i32
  }
  func.func @transform_2(%arg0: i32, %arg1: i32) -> (i32, i32, i32) {
    %c0_i32 = arith.constant 0 : i32
    %c0_i32_0 = arith.constant 0 : i32
    return %arg0, %c0_i32, %arg1 : i32, i32, i32
  }
}

</mosaic_0001>

<bundles_post_ra>
// kernel: tpu_custom_call.1
= control target key start
LH: loop header
LB: loop body
LE: loop exit
PB: predicated region body
PF: predicated region fallthrough
CT: control target
= control target key end

     0   :  { %8 = vsyncpa [#allocation3], 0  ;;  %s995_s0 = inlined_call_operand.hbm [shape: f32[2,48,128], index: 0, kind: input, shape index: {}]   ;;  %s996_s1 = inlined_call_operand.hbm [shape: f32[2,48,128], index: 1, kind: output, shape index: {0}]   ;;  %s997_s2 = inlined_call_operand.hbm [shape: f32[2,48,128], index: 2, kind: output, shape index: {1}]  }
   0x1   :  { %9 = vsyncpa [#allocation4], 0 }
   0x2   :  { %10 = vsyncpa [#allocation7], 0  ;;  %s663_s9 = smov [#allocation2]   ;;  %s591_s13 = scalar_lea.hbm %s995_s0, 1536 }
   0x3   :  { %s16_s10 = sshll.u32 %s663_s9, 4  ;;  %p592_p0 = scmp.ne.s32.totalorder %s995_s0, %s591_s13  ;;  %s17_s10 = int_to_ptr.vmem [resolvable:$true] %s16_s10 }
   0x4   :  { %p595_p1 = scmp.lt.u32.totalorder %s591_s13, %s995_s0 }
   0x6   :  { %p597_p2 = pnand %p595_p1, %p592_p0 }
   0x8   :  { %600 = shalt.err (!%p597_p2)
}
   0x9   :  { %s601_s18 = scalar_lea.vmem %s17_s10, 1536  ;;  %p606_p4 = scmp.lt.s32.totalorder %s17_s10, %s17_s10 }
   0xa   :  { %p602_p3 = scmp.ne.s32.totalorder %s17_s10, %s601_s18  ;;  %p607_p5 = scmp.lt.s32.totalorder %s601_s18, %s601_s18 }
   0xc   :  { %p608_p6 = por %p607_p5, %p606_p4 }
   0xe   :  { %p609_p7 = pnand %p608_p6, %p602_p3 }
  0x10   :  { %612 = shalt.err (!%p609_p7)
}
  0x11   :  { %s664_s19 = smov 128   ;;  %s665_s20 = smov 8  }
  0x12   :  { %22 = dma.hbm_to_vmem [thread:$0]  %s995_s0, 1536, %s17_s10, [#allocation3], %s664_s19, %s664_s19, %s665_s20  }
  0x13   :  { %657 = dma.done.wait [#allocation3], 1536  }
  0x14   :  { %658 = vsyncadd [#allocation3], 4294965760  ;;  %v38_v0 = vlaneseq  ;;  %v702_v4 = vld [vmem:[#allocation2] sm:$0xff]  ;;  %v704_v5 = vld [vmem:[#allocation2 + $0x8] sm:$0xff]  ;;  %vm68_vm0 = vcmask 1043456   ;;  %vm115_vm1 = vcmask 1046528  }
  0x15   :  { %v706_v6 = vld [vmem:[#allocation2 + $0x10] sm:$0xff]  ;;  %v708_v7 = vld [vmem:[#allocation2 + $0x18] sm:$0xff]  ;;  %v710_v8 = vld [vmem:[#allocation2 + $0x20] sm:$0xff]  ;;  %v69_v11 = vrot.slane %v702_v4, 4  ;;  %v70_v12 = vrot.slane %v704_v5, 4  ;;  %vm204_vm2 = vcmask 1045504  }
  0x16   :  { %v698_v1 = vshrl.u32 %v38_v0, 7  ;;  %v712_v9 = vld [vmem:[#allocation2 + $0x28] sm:$0xff]  ;;  %v72_v13 = vrot.slane %v706_v6, 4  ;;  %v722_v14 = vld [vmem:[#allocation2 + $0x50] sm:$0xff]  ;;  %v724_v15 = vld [vmem:[#allocation2 + $0x58] sm:$0xff]  ;;  %v74_v17 = vrot.slane %v708_v7, 4 }
  0x17   :  { %v76_v18 = vrot.slane %v710_v8, 4  ;;  %v78_v19 = vrot.slane %v712_v9, 4  ;;  %v732_v21 = vsel %vm68_vm0, %v69_v11, %v70_v12  ;;  %v87_v23 = vrot.slane %v722_v14, 4  ;;  %s666_s0 = smov [#allocation6]   ;;  %s667_s24 = smov [#allocation5]  }
  0x18   :  { %v40_v2 = vsub.s32 0, %v698_v1  ;;  %v48_v3 = vsub.s32 7, %v698_v1  ;;  %v735_v22 = vsel %vm68_vm0, %v70_v12, %v72_v13  ;;  %v739_v24 = vsel %vm68_vm0, %v72_v13, %v74_v17  ;;  %s570_s23 = sshll.u32 %s666_s0, 4  ;;  %s558_s25 = sshll.u32 %s667_s24, 4  ;;  %s571_s23 = int_to_ptr.vmem [resolvable:$true] %s570_s23  ;;  %s958_s25 = int_to_ptr.vmem [resolvable:$true] %s558_s25 }
  0x19   :  { %v742_v25 = vsel %vm68_vm0, %v74_v17, %v76_v18  ;;  %v79_v26 = vsel %vm68_vm0, %v76_v18, %v78_v19  ;;  %v89_v27 = vrot.slane %v724_v15, 4  ;;  %v119_v31 = vrot.slane %v732_v21, 1  ;;  %s613_s26 = scalar_lea.vmem %s571_s23, 1536  ;;  %p618_p9 = scmp.lt.s32.totalorder %s571_s23, %s571_s23 }
  0x1a   :  { %v717_v10 = vrot.slane %v702_v4, %v40_v2  ;;  %v49_v16 = vrot.slane %v712_v9, %v48_v3  ;;  %v53_v20 = vrot.slane %v724_v15, %v48_v3  ;;  %v121_v35 = vrot.slane %v735_v22, 1  ;;  %p614_p8 = scmp.ne.s32.totalorder %s571_s23, %s613_s26  ;;  %p619_p10 = scmp.lt.s32.totalorder %s613_s26, %s613_s26 }
  0x1b   :  { %v756_v32 = vsel %vm68_vm0, %v87_v23, %v89_v27  ;;  %v123_v36 = vrot.slane %v739_v24, 1  ;;  %v125_v37 = vrot.slane %v742_v25, 1  ;;  %v127_v38 = vrot.slane %v79_v26, 1 }
  0x1c   :  { %v748_v28 = vsel %vm68_vm0, %v717_v10, %v69_v11  ;;  %v109_v29 = vsel %vm68_vm0, %v78_v19, %v49_v16  ;;  %v116_v30 = vrot.slane %v717_v10, 1  ;;  %v759_v33 = vsel %vm68_vm0, %v89_v27, %v53_v20  ;;  %p620_p11 = por %p619_p10, %p618_p9 }
  0x1d   :  { %v117_v34 = vrot.slane %v748_v28, 1  ;;  %v129_v39 = vrot.slane %v109_v29, 1  ;;  %v122_v42 = vsel %vm115_vm1, %v119_v31, %v121_v35  ;;  %v131_v43 = vrot.slane %v49_v16, 1 }
  0x1e   :  { %v124_v44 = vsel %vm115_vm1, %v121_v35, %v123_v36  ;;  %v126_v45 = vsel %vm115_vm1, %v123_v36, %v125_v37  ;;  %v128_v46 = vsel %vm115_vm1, %v125_v37, %v127_v38  ;;  %v144_v47 = vrot.slane %v756_v32, 1  ;;  %p621_p12 = pnand %p620_p11, %p614_p8 }
  0x1f   :  { %v118_v40 = vsel %vm115_vm1, %v116_v30, %v117_v34  ;;  %v120_v41 = vsel %vm115_vm1, %v117_v34, %v119_v31  ;;  %v132_v48 = vsel %vm115_vm1, %v129_v39, %v131_v43  ;;  %v146_v49 = vrot.slane %v759_v33, 1 }
  0x20   :  { %v148_v50 = vrot.slane %v53_v20, 1  ;;  %v168_v51 = vadd.f32 %v118_v40, %v717_v10  ;;  %v169_v52 = vadd.f32 %v120_v41, %v748_v28  ;;  %v170_v53 = vadd.f32 %v122_v42, %v732_v21 }
  0x21   :  { %v171_v54 = vadd.f32 %v124_v44, %v735_v22  ;;  %v172_v55 = vadd.f32 %v126_v45, %v739_v24  ;;  %v173_v57 = vadd.f32 %v128_v46, %v742_v25  ;;  %v175_v58 = vadd.f32 %v132_v48, %v109_v29 }
  0x22   :  { %v149_v56 = vsel %vm115_vm1, %v146_v49, %v148_v50  ;;  %v176_v59 = vadd.f32 %v131_v43, %v49_v16  ;;  %v786_v61 = vadd.f32 %v148_v50, %v53_v20  ;;  %v205_v62 = vrot.slane %v168_v51, 2 }
  0x23   :  { %v784_v60 = vadd.f32 %v149_v56, %v759_v33  ;;  %v206_v63 = vrot.slane %v169_v52, 2  ;;  %v208_v0 = vrot.slane %v170_v53, 2  ;;  %v210_v3 = vrot.slane %v171_v54, 2 }
  0x24   :  { %v212_v11 = vrot.slane %v172_v55, 2  ;;  %v214_v12 = vrot.slane %v173_v57, 2  ;;  %v130_v17 = vsel %vm115_vm1, %v127_v38, %v129_v39  ;;  %v218_v18 = vrot.slane %v175_v58, 2  ;;  %v795_v38 = vld [vmem:[#allocation2 + $0x30] sm:$0xff] }
  0x25   :  { %v207_v13 = vsel %vm204_vm2, %v205_v62, %v206_v63  ;;  %v220_v19 = vrot.slane %v176_v59, 2  ;;  %v209_v27 = vsel %vm204_vm2, %v206_v63, %v208_v0  ;;  %v211_v16 = vsel %vm204_vm2, %v208_v0, %v210_v3 }
  0x26   :  { %v213_v29 = vsel %vm204_vm2, %v210_v3, %v212_v11  ;;  %v215_v20 = vsel %vm204_vm2, %v212_v11, %v214_v12  ;;  %v257_v30 = vadd.f32 %v207_v13, %v168_v51  ;;  %v258_v31 = vadd.f32 %v209_v27, %v169_v52 }
  0x27   :  { %v259_v34 = vadd.f32 %v211_v16, %v170_v53  ;;  %v260_v35 = vadd.f32 %v213_v29, %v171_v54  ;;  %v261_v36 = vadd.f32 %v215_v20, %v172_v55  ;;  %v174_v37 = vadd.f32 %v130_v17, %v79_v26 }
  0x28   :  { %v221_v40 = vsel %vm204_vm2, %v218_v18, %v220_v19  ;;  %v265_v41 = vadd.f32 %v220_v19, %v176_v59  ;;  %v293_v39 = vrot.slane %v257_v30, 4  ;;  %v294_v42 = vrot.slane %v258_v31, 4 }
  0x29   :  { %v296_v43 = vrot.slane %v259_v34, 4  ;;  %v298_v44 = vrot.slane %v260_v35, 4  ;;  %v300_v45 = vrot.slane %v261_v36, 4  ;;  %v216_v46 = vrot.slane %v174_v37, 2 }
  0x2a   :  { %v264_v48 = vadd.f32 %v221_v40, %v175_v58  ;;  %v308_v50 = vrot.slane %v265_v41, 4  ;;  %v295_v51 = vsel %vm68_vm0, %v293_v39, %v294_v42  ;;  %v803_v26 = vrot.slane %v795_v38, %v40_v2 }
  0x2b   :  { %v297_v52 = vsel %vm68_vm0, %v294_v42, %v296_v43  ;;  %v299_v53 = vsel %vm68_vm0, %v296_v43, %v298_v44  ;;  %v301_v54 = vsel %vm68_vm0, %v298_v44, %v300_v45  ;;  %v345_v55 = vadd.f32 %v295_v51, %v257_v30 }
  0x2c   :  { %v346_v56 = vadd.f32 %v297_v52, %v258_v31  ;;  %v347_v59 = vadd.f32 %v299_v53, %v259_v34  ;;  %v348_v62 = vadd.f32 %v301_v54, %v260_v35  ;;  %v217_v58 = vsel %vm204_vm2, %v214_v12, %v216_v46 }
  0x2d   :  { %v219_v63 = vsel %vm204_vm2, %v216_v46, %v218_v18  ;;  %v306_v0 = vrot.slane %v264_v48, 4  ;;  %v377_v3 = vrot.slane %v345_v55, 1  ;;  %v262_v17 = vadd.f32 %v217_v58, %v173_v57 }
  0x2e   :  { %v378_v11 = vrot.slane %v346_v56, 1  ;;  %v427_v13 = vadd.f32 %v347_v59, %v346_v56  ;;  %v428_v19 = vadd.f32 %v348_v62, %v347_v59  ;;  %v380_v1 = vrot.slane %v347_v59, 1 }
  0x2f   :  { %v263_v27 = vadd.f32 %v219_v63, %v174_v37  ;;  %v382_v2 = vrot.slane %v348_v62, 1  ;;  %v302_v20 = vrot.slane %v262_v17, 4  ;;  %v309_v30 = vsel %vm68_vm0, %v306_v0, %v308_v50 }
  0x30   :  { %v379_v16 = vsel %vm115_vm1, %v377_v3, %v378_v11  ;;  %v455_v29 = vrot.slane %v427_v13, 1  ;;  %v456_v12 = vrot.slane %v428_v19, 1  ;;  %v381_v18 = vsel %vm115_vm1, %v378_v11, %v380_v1 }
  0x31   :  { %v415_v31 = vadd.f32 %v379_v16, %v717_v10  ;;  %v304_v34 = vrot.slane %v263_v27, 4  ;;  %v303_v35 = vsel %vm68_vm0, %v300_v45, %v302_v20  ;;  %v416_v57 = vadd.f32 %v381_v18, %v748_v28  ;;  %v830_v16 = vld [vmem:[#allocation2 + $0x38] sm:$0xff] }
  0x32   :  { %v383_v40 = vsel %vm115_vm1, %v380_v1, %v382_v2  ;;  %v352_v37 = vadd.f32 %v309_v30, %v264_v48  ;;  %v457_v39 = vsel %vm115_vm1, %v455_v29, %v456_v12  ;;  %v349_v42 = vadd.f32 %v303_v35, %v261_v36  ;;  %v832_v29 = vld [vmem:[#allocation2 + $0x40] sm:$0xff] }
  0x33   :  { %v305_v43 = vsel %vm68_vm0, %v302_v20, %v304_v34  ;;  %v417_v44 = vadd.f32 %v383_v40, %v732_v21  ;;  %v493_v46 = vadd.f32 %v457_v39, %v415_v31  ;;  %v307_v51 = vsel %vm68_vm0, %v304_v34, %v306_v0 }
  0x34   :  { %v350_v10 = vadd.f32 %v305_v43, %v262_v17  ;;  %v353_v52 = vadd.f32 %v308_v50, %v265_v41  ;;  %v429_v53 = vadd.f32 %v349_v42, %v348_v62  ;;  %v351_v54 = vadd.f32 %v307_v51, %v263_v27 }
  0x35   :  { %v384_v45 = vrot.slane %v349_v42, 1  ;;  %v80_v28 = vrot.slane %v795_v38, 4  ;;  %v820_v55 = vmul.f32 0.04, %v493_v46  ;;  %v83_v39 = vrot.slane %v832_v29, 4 }
  0x36   :  { %v430_v48 = vadd.f32 %v350_v10, %v349_v42  ;;  %v386_v56 = vrot.slane %v350_v10, 1  ;;  %v433_v59 = vadd.f32 %v353_v52, %v352_v37  ;;  %v458_v36 = vrot.slane %v429_v53, 1 }
  0x37   :  { %v385_v58 = vsel %vm115_vm1, %v382_v2, %v384_v45  ;;  %v431_v63 = vadd.f32 %v351_v54, %v350_v10  ;;  %v432_v21 = vadd.f32 %v352_v37, %v351_v54  ;;  %529 = vst [vmem:[#allocation6] sm:$0xff] %v820_v55  ;;  %v388_v62 = vrot.slane %v351_v54, 1 }
  0x38   :  { %v460_v3 = vrot.slane %v430_v48, 1  ;;  %v418_v41 = vadd.f32 %v385_v58, %v735_v22  ;;  %v387_v50 = vsel %vm115_vm1, %v384_v45, %v386_v56  ;;  %v459_v0 = vsel %vm115_vm1, %v456_v12, %v458_v36  ;;  %v837_v12 = vld [vmem:[#allocation2 + $0x48] sm:$0xff] }
  0x39   :  { %v462_v11 = vrot.slane %v431_v63, 1  ;;  %v419_v13 = vadd.f32 %v387_v50, %v739_v24  ;;  %v464_v17 = vrot.slane %v432_v21, 1  ;;  %v494_v19 = vadd.f32 %v459_v0, %v416_v57 }
  0x3a   :  { %v461_v1 = vsel %vm115_vm1, %v458_v36, %v460_v3  ;;  %v389_v27 = vsel %vm115_vm1, %v386_v56, %v388_v62  ;;  %v466_v2 = vrot.slane %v433_v59, 1  ;;  %v81_v37 = vrot.slane %v830_v16, 4 }
  0x3b   :  { %v495_v22 = vadd.f32 %v461_v1, %v417_v44  ;;  %v463_v20 = vsel %vm115_vm1, %v460_v3, %v462_v11  ;;  %v465_v30 = vsel %vm115_vm1, %v462_v11, %v464_v17  ;;  %v420_v31 = vadd.f32 %v389_v27, %v742_v25 }
  0x3c   :  { %v839_v24 = vmul.f32 0.04, %v494_v19  ;;  %v496_v18 = vadd.f32 %v463_v20, %v418_v41  ;;  %v497_v34 = vadd.f32 %v465_v30, %v419_v13  ;;  %v467_v35 = vsel %vm115_vm1, %v464_v17, %v466_v2 }
  0x3d   :  { %v842_v57 = vmul.f32 0.04, %v495_v22  ;;  %v498_v40 = vadd.f32 %v467_v35, %v420_v31  ;;  %v85_v43 = vrot.slane %v837_v12, 4  ;;  %v854_v44 = vsel %vm68_vm0, %v803_v26, %v80_v28 }
  0x3e   :  { %530 = vst [vmem:[#allocation6 + $0x8] sm:$0xff] %v839_v24  ;;  %v847_v42 = vmul.f32 0.04, %v496_v18  ;;  %v849_v25 = vmul.f32 0.04, %v497_v34  ;;  %v860_v10 = vsel %vm68_vm0, %v80_v28, %v81_v37  ;;  %v863_v51 = vsel %vm68_vm0, %v81_v37, %v83_v39 }
  0x3f   :  { %531 = vst [vmem:[#allocation6 + $0x10] sm:$0xff] %v842_v57  ;;  %v857_v46 = vmul.f32 0.04, %v498_v40  ;;  %v133_v52 = vrot.slane %v803_v26, 1  ;;  %v869_v53 = vsel %vm68_vm0, %v83_v39, %v85_v43  ;;  %v874_v54 = vsel %vm68_vm0, %v85_v43, %v87_v23 }
  0x40   :  { %532 = vst [vmem:[#allocation6 + $0x18] sm:$0xff] %v847_v42  ;;  %533 = vst [vmem:[#allocation6 + $0x20] sm:$0xff] %v849_v25  ;;  %v134_v45 = vrot.slane %v854_v44, 1  ;;  %v136_v28 = vrot.slane %v860_v10, 1  ;;  %v138_v48 = vrot.slane %v863_v51, 1  ;;  %v140_v56 = vrot.slane %v869_v53, 1 }
  0x41   :  { %534 = vst [vmem:[#allocation6 + $0x28] sm:$0xff] %v857_v46  ;;  %v142_v59 = vrot.slane %v874_v54, 1  ;;  %v147_v36 = vsel %vm115_vm1, %v144_v47, %v146_v49  ;;  %v235_v21 = vrot.slane %v784_v60, 2  ;;  %v237_v1 = vrot.slane %v786_v61, 2 }
  0x42   :  { %v135_v23 = vsel %vm115_vm1, %v133_v52, %v134_v45  ;;  %v137_v58 = vsel %vm115_vm1, %v134_v45, %v136_v28  ;;  %v183_v63 = vadd.f32 %v147_v36, %v756_v32  ;;  %v139_v3 = vsel %vm115_vm1, %v136_v28, %v138_v48 }
  0x43   :  { %v141_v41 = vsel %vm115_vm1, %v138_v48, %v140_v56  ;;  %v143_v50 = vsel %vm115_vm1, %v140_v56, %v142_v59  ;;  %v145_v33 = vsel %vm115_vm1, %v142_v59, %v144_v47  ;;  %v177_v49 = vadd.f32 %v135_v23, %v803_v26 }
  0x44   :  { %v178_v62 = vadd.f32 %v137_v58, %v854_v44  ;;  %v179_v0 = vadd.f32 %v139_v3, %v860_v10  ;;  %v180_v11 = vadd.f32 %v141_v41, %v863_v51  ;;  %v181_v13 = vadd.f32 %v143_v50, %v869_v53 }
  0x45   :  { %v182_v17 = vadd.f32 %v145_v33, %v874_v54  ;;  %v233_v19 = vrot.slane %v183_v63, 2  ;;  %v222_v27 = vrot.slane %v177_v49, 2  ;;  %v238_v31 = vsel %vm204_vm2, %v235_v21, %v237_v1 }
  0x46   :  { %v223_v2 = vrot.slane %v178_v62, 2  ;;  %v225_v32 = vrot.slane %v179_v0, 2  ;;  %v227_v22 = vrot.slane %v180_v11, 2  ;;  %v229_v47 = vrot.slane %v181_v13, 2 }
  0x47   :  { %v231_v20 = vrot.slane %v182_v17, 2  ;;  %v236_v30 = vsel %vm204_vm2, %v233_v19, %v235_v21 }
  0x48   :  { %v224_v18 = vsel %vm204_vm2, %v222_v27, %v223_v2  ;;  %v226_v34 = vsel %vm204_vm2, %v223_v2, %v225_v32  ;;  %v228_v35 = vsel %vm204_vm2, %v225_v32, %v227_v22  ;;  %v272_v40 = vadd.f32 %v236_v30, %v183_v63 }
  0x49   :  { %v230_v37 = vsel %vm204_vm2, %v227_v22, %v229_v47  ;;  %v232_v39 = vsel %vm204_vm2, %v229_v47, %v231_v20  ;;  %v266_v43 = vadd.f32 %v224_v18, %v177_v49  ;;  %v267_v52 = vadd.f32 %v226_v34, %v178_v62 }
  0x4a   :  { %v268_v45 = vadd.f32 %v228_v35, %v179_v0  ;;  %v269_v28 = vadd.f32 %v230_v37, %v180_v11  ;;  %v270_v48 = vadd.f32 %v232_v39, %v181_v13  ;;  %v234_v56 = vsel %vm204_vm2, %v231_v20, %v233_v19 }
  0x4b   :  { %v310_v59 = vrot.slane %v266_v43, 4  ;;  %v311_v36 = vrot.slane %v267_v52, 4  ;;  %v271_v23 = vadd.f32 %v234_v56, %v182_v17  ;;  %v321_v58 = vrot.slane %v272_v40, 4 }
  0x4c   :  { %v313_v21 = vrot.slane %v268_v45, 4  ;;  %v315_v3 = vrot.slane %v269_v28, 4  ;;  %v317_v41 = vrot.slane %v270_v48, 4  ;;  %v273_v63 = vadd.f32 %v238_v31, %v784_v60 }
  0x4d   :  { %v312_v50 = vsel %vm68_vm0, %v310_v59, %v311_v36  ;;  %v319_v33 = vrot.slane %v271_v23, 4  ;;  %v274_v49 = vadd.f32 %v237_v1, %v786_v61  ;;  %v517_v62 = vsub.f32 %v702_v4, %v820_v55 }
  0x4e   :  { %v314_v0 = vsel %vm68_vm0, %v311_v36, %v313_v21  ;;  %v316_v11 = vsel %vm68_vm0, %v313_v21, %v315_v3  ;;  %v318_v13 = vsel %vm68_vm0, %v315_v3, %v317_v41  ;;  %v354_v17 = vadd.f32 %v312_v50, %v266_v43 }
  0x4f   :  { %v355_v19 = vadd.f32 %v314_v0, %v267_v52  ;;  %v356_v27 = vadd.f32 %v316_v11, %v268_v45  ;;  %v357_v2 = vadd.f32 %v318_v13, %v269_v28  ;;  %v320_v60 = vsel %vm68_vm0, %v317_v41, %v319_v33  ;;  %541 = vst [vmem:[#allocation5] sm:$0xff] %v517_v62 }
  0x50   :  { %v390_v32 = vrot.slane %v354_v17, 1  ;;  %v358_v22 = vadd.f32 %v320_v60, %v270_v48  ;;  %v322_v61 = vsel %vm68_vm0, %v319_v33, %v321_v58  ;;  %v323_v1 = vrot.slane %v273_v63, 4 }
  0x51   :  { %v391_v47 = vrot.slane %v355_v19, 1  ;;  %v434_v4 = vadd.f32 %v356_v27, %v355_v19  ;;  %v435_v55 = vadd.f32 %v357_v2, %v356_v27  ;;  %v393_v20 = vrot.slane %v356_v27, 1 }
  0x52   :  { %v436_v30 = vadd.f32 %v358_v22, %v357_v2  ;;  %v359_v31 = vadd.f32 %v322_v61, %v271_v23  ;;  %v395_v18 = vrot.slane %v357_v2, 1  ;;  %v324_v34 = vsel %vm68_vm0, %v321_v58, %v323_v1 }
  0x53   :  { %v392_v35 = vsel %vm115_vm1, %v390_v32, %v391_v47  ;;  %v468_v37 = vrot.slane %v434_v4, 1  ;;  %v469_v39 = vrot.slane %v435_v55, 1  ;;  %v394_v43 = vsel %vm115_vm1, %v391_v47, %v393_v20 }
  0x54   :  { %v421_v52 = vadd.f32 %v392_v35, %v803_v26  ;;  %v422_v45 = vadd.f32 %v394_v43, %v854_v44  ;;  %v471_v28 = vrot.slane %v436_v30, 1  ;;  %v396_v48 = vsel %vm115_vm1, %v393_v20, %v395_v18 }
  0x55   :  { %v470_v56 = vsel %vm115_vm1, %v468_v37, %v469_v39  ;;  %v423_v59 = vadd.f32 %v396_v48, %v860_v10  ;;  %v437_v36 = vadd.f32 %v359_v31, %v358_v22  ;;  %v360_v23 = vadd.f32 %v324_v34, %v272_v40 }
  0x56   :  { %v499_v58 = vadd.f32 %v470_v56, %v421_v52  ;;  %v472_v21 = vsel %vm115_vm1, %v469_v39, %v471_v28  ;;  %v397_v3 = vrot.slane %v358_v22, 1  ;;  %v325_v41 = vrot.slane %v274_v49, 4 }
  0x57   :  { %v500_v50 = vadd.f32 %v472_v21, %v422_v45  ;;  %v473_v33 = vrot.slane %v437_v36, 1  ;;  %v438_v62 = vadd.f32 %v360_v23, %v359_v31  ;;  %v399_v26 = vrot.slane %v359_v31, 1 }
  0x58   :  { %v511_v0 = vmul.f32 0.04, %v499_v58  ;;  %v398_v44 = vsel %vm115_vm1, %v395_v18, %v397_v3  ;;  %v326_v11 = vsel %vm68_vm0, %v323_v1, %v325_v41  ;;  %v362_v13 = vadd.f32 %v325_v41, %v274_v49 }
  0x59   :  { %v512_v17 = vmul.f32 0.04, %v500_v50  ;;  %v474_v10 = vsel %vm115_vm1, %v471_v28, %v473_v33  ;;  %v424_v40 = vadd.f32 %v398_v44, %v863_v51  ;;  %v475_v19 = vrot.slane %v438_v62, 1 }
  0x5a   :  { %535 = vst [vmem:[#allocation6 + $0x30] sm:$0xff] %v511_v0  ;;  %v501_v27 = vadd.f32 %v474_v10, %v423_v59  ;;  %v361_v2 = vadd.f32 %v326_v11, %v273_v63  ;;  %v400_v60 = vsel %vm115_vm1, %v397_v3, %v399_v26  ;;  %v401_v32 = vrot.slane %v360_v23, 1 }
  0x5b   :  { %536 = vst [vmem:[#allocation6 + $0x38] sm:$0xff] %v512_v17  ;;  %v476_v22 = vsel %vm115_vm1, %v473_v33, %v475_v19  ;;  %v425_v61 = vadd.f32 %v400_v60, %v869_v53  ;;  %v518_v49 = vsub.f32 %v704_v5, %v839_v24  ;;  %v519_v1 = vsub.f32 %v706_v6, %v842_v57 }
  0x5c   :  { %v513_v47 = vmul.f32 0.04, %v501_v27  ;;  %v502_v51 = vadd.f32 %v476_v22, %v424_v40  ;;  %v439_v4 = vadd.f32 %v361_v2, %v360_v23  ;;  %v402_v55 = vsel %vm115_vm1, %v399_v26, %v401_v32 }
  0x5d   :  { %v426_v63 = vadd.f32 %v402_v55, %v874_v54  ;;  %v440_v20 = vadd.f32 %v362_v13, %v361_v2  ;;  %542 = vst [vmem:[#allocation5 + $0x8] sm:$0xff] %v518_v49  ;;  %543 = vst [vmem:[#allocation5 + $0x10] sm:$0xff] %v519_v1  ;;  %v520_v30 = vsub.f32 %v708_v7, %v847_v42 }
  0x5e   :  { %v521_v53 = vsub.f32 %v710_v8, %v849_v25  ;;  %537 = vst [vmem:[#allocation6 + $0x40] sm:$0xff] %v513_v47  ;;  %v514_v5 = vmul.f32 0.04, %v502_v51  ;;  %v477_v24 = vrot.slane %v439_v4, 1  ;;  %v522_v6 = vsub.f32 %v712_v9, %v857_v46 }
  0x5f   :  { %v523_v57 = vsub.f32 %v795_v38, %v511_v0  ;;  %v479_v31 = vrot.slane %v440_v20, 1  ;;  %544 = vst [vmem:[#allocation5 + $0x18] sm:$0xff] %v520_v30  ;;  %v524_v54 = vsub.f32 %v830_v16, %v512_v17  ;;  %v525_v18 = vsub.f32 %v832_v29, %v513_v47 }
  0x60   :  { %545 = vst [vmem:[#allocation5 + $0x20] sm:$0xff] %v521_v53  ;;  %538 = vst [vmem:[#allocation6 + $0x48] sm:$0xff] %v514_v5  ;;  %v478_v7 = vsel %vm115_vm1, %v475_v19, %v477_v24  ;;  %v526_v8 = vsub.f32 %v837_v12, %v514_v5 }
  0x61   :  { %546 = vst [vmem:[#allocation5 + $0x28] sm:$0xff] %v522_v6  ;;  %547 = vst [vmem:[#allocation5 + $0x30] sm:$0xff] %v523_v57  ;;  %v503_v42 = vadd.f32 %v478_v7, %v425_v61  ;;  %v480_v25 = vsel %vm115_vm1, %v477_v24, %v479_v31 }
  0x62   :  { %548 = vst [vmem:[#allocation5 + $0x38] sm:$0xff] %v524_v54  ;;  %549 = vst [vmem:[#allocation5 + $0x40] sm:$0xff] %v525_v18  ;;  %v504_v9 = vadd.f32 %v480_v25, %v426_v63 }
  0x63   :  { %550 = vst [vmem:[#allocation5 + $0x48] sm:$0xff] %v526_v8  ;;  %v515_v38 = vmul.f32 0.04, %v503_v42 }
  0x64   :  { %v516_v16 = vmul.f32 0.04, %v504_v9 }
  0x65   :  { %539 = vst [vmem:[#allocation6 + $0x50] sm:$0xff] %v515_v38  ;;  %v527_v29 = vsub.f32 %v722_v14, %v515_v38 }
  0x66   :  { %540 = vst [vmem:[#allocation6 + $0x58] sm:$0xff] %v516_v16  ;;  %v528_v12 = vsub.f32 %v724_v15, %v516_v16 }
  0x67   :  { %551 = vst [vmem:[#allocation5 + $0x50] sm:$0xff] %v527_v29 }
  0x68   :  { %624 = shalt.err (!%p621_p12)
}
  0x69   :  { %s625_s29 = scalar_lea.hbm %s997_s2, 1536 }
  0x6a   :  { %p626_p13 = scmp.ne.s32.totalorder %s997_s2, %s625_s29  ;;  %p629_p0 = scmp.lt.u32.totalorder %s625_s29, %s997_s2 }
  0x6c   :  { %p631_p1 = pnand %p629_p0, %p626_p13 }
  0x6e   :  { %634 = shalt.err (!%p631_p1)
}
  0x6f   :  { %576 = dma.vmem_to_hbm [thread:$0]  %s571_s23, 1536, %s997_s2, [#allocation7], %s664_s19, %s664_s19, %s665_s20   ;;  %552 = vst [vmem:[#allocation5 + $0x58] sm:$0xff] %v528_v12 }
  0x70   :  { %s635_s8 = scalar_lea.vmem %s958_s25, 1536  ;;  %p640_p3 = scmp.lt.s32.totalorder %s958_s25, %s958_s25 }
  0x71   :  { %p636_p2 = scmp.ne.s32.totalorder %s958_s25, %s635_s8  ;;  %p641_p4 = scmp.lt.s32.totalorder %s635_s8, %s635_s8 }
  0x73   :  { %p642_p5 = por %p641_p4, %p640_p3 }
  0x75   :  { %p643_p6 = pnand %p642_p5, %p636_p2 }
  0x77   :  { %646 = shalt.err (!%p643_p6)
}
  0x78   :  { %s647_s11 = scalar_lea.hbm %s996_s1, 1536 }
  0x79   :  { %p648_p7 = scmp.ne.s32.totalorder %s996_s1, %s647_s11  ;;  %p651_p8 = scmp.lt.u32.totalorder %s647_s11, %s996_s1 }
  0x7b   :  { %p653_p9 = pnand %p651_p8, %p648_p7 }
  0x7d   :  { %656 = shalt.err (!%p653_p9)
}
  0x7e   :  { %564 = dma.vmem_to_hbm [thread:$0]  %s958_s25, 1536, %s996_s1, [#allocation4], %s664_s19, %s664_s19, %s665_s20  }
  0x7f   :  { %659 = dma.done.wait [#allocation4], 1536  }
  0x80   :  { %660 = vsyncadd [#allocation4], 4294965760 }
  0x81   :  { %661 = dma.done.wait [#allocation7], 1536  }
  0x82   :  { %662 = vsyncadd [#allocation7], 4294965760 }
  0x83   :  { %583 = vsyncpa [#allocation3], 1 }
  0x84   :  { %584 = vsyncpa [#allocation4], 1 }
  0x85   :  { %585 = vsyncpa [#allocation7], 1 }

</bundles_post_ra>
